<compile_context>
chip_gen: v6e
topology: v6e:2x2x1
jax: 0.10.0
libtpu: 0.0.40
codegen_flags: <defaults>
</compile_context>

<pallas_src>
import functools

import jax
import jax.numpy as jnp
from jax.experimental import pallas as pl
from jax.experimental.pallas import tpu as pltpu


def _round_up(x: int, m: int) -> int:
    return ((x + m - 1) // m) * m


def _pad2(a, rows: int, cols: int):
    r, c = a.shape
    return jnp.pad(a, ((0, rows - r), (0, cols - c)))


def _choose_tiles(n: int, tile_rows=None, tile_k=None):
    """n_pad is only 128-aligned; tm/tk are divisors of n_pad (no over-pad)."""
    n128 = _round_up(n, 128)
    if tile_rows is not None:
        tm = int(tile_rows)
        n_pad = _round_up(n128, tm)
    else:
        cap = 512 if n128 > 2048 else 256
        # keep >= 2 row tiles when possible so both v7x TensorCores get work
        cap = min(cap, max(128, (n128 // 2) // 128 * 128))
        tm = 128
        for cand in range(cap, 127, -128):
            if n128 % cand == 0:
                tm = cand
                break
        n_pad = n128
    if tile_k is not None:
        tk = int(tile_k)
        assert n_pad % tk == 0, (n_pad, tk)
    else:
        tk = 128
        for cand in range(min(1024, n_pad), 127, -128):
            if n_pad % cand == 0:
                tk = cand
                break
    return n_pad, tm, tk


# --------------------------------------------------------------------------
# Two-pass path (large N): adj streamed in (tm, tk) tiles, support1/s2 resident
# --------------------------------------------------------------------------
def _gc1_kernel(adj_ref, s1_ref, b1_ref, w2_ref, s2_ref, acc_ref, *, tk):
    """s2[i] = relu(sum_k adj[i,k] @ support1[k] + b1) @ w2  (one (i,k) step)."""
    k = pl.program_id(1)

    @pl.when(k == 0)
    def _init():
        acc_ref[...] = jnp.zeros_like(acc_ref)

    k0 = pl.multiple_of(k * tk, tk)
    acc_ref[...] += jnp.dot(adj_ref[...], s1_ref[pl.ds(k0, tk), :],
                            preferred_element_type=jnp.float32)

    @pl.when(k == pl.num_programs(1) - 1)
    def _finalize():
        h1 = jnp.maximum(acc_ref[...] + b1_ref[...], 0.0)
        # TODO(synk): F.dropout(training=self.training) is identity at inference.
        s2_ref[...] = jnp.dot(h1.astype(w2_ref.dtype), w2_ref[...],
                              preferred_element_type=jnp.float32
                              ).astype(s2_ref.dtype)


def _gc2_maxpool_kernel(adj_ref, s2_ref, out_ref, acc_ref, *,
                        tk, n_valid, tile_rows):
    """Accumulate adj @ s2 over k; at the last k emit the per-tile column max."""
    i = pl.program_id(0)
    k = pl.program_id(1)

    @pl.when(k == 0)
    def _init():
        acc_ref[...] = jnp.zeros_like(acc_ref)

    k0 = pl.multiple_of(k * tk, tk)
    acc_ref[...] += jnp.dot(adj_ref[...], s2_ref[pl.ds(k0, tk), :],
                            preferred_element_type=jnp.float32)

    @pl.when(k == pl.num_programs(1) - 1)
    def _finalize():
        h2 = acc_ref[...]
        # Mask rows that only exist because of padding so they can't win the max.
        row = i * tile_rows + jax.lax.broadcasted_iota(jnp.int32, h2.shape, 0)
        h2 = jnp.where(row < n_valid, h2, -jnp.inf)
        out_ref[...] = jnp.broadcast_to(jnp.max(h2, axis=0, keepdims=True),
                                        out_ref.shape)


# --------------------------------------------------------------------------
# Fused path (small/medium N): adj resident in VMEM, read from HBM once
# --------------------------------------------------------------------------
def _fused_kernel(adj_ref, s1_ref, b1_ref, w2_ref, out_ref, s2_ref, *,
                  n_valid, tile_rows):
    """Phase 0: s2 = relu(adj @ s1 + b1) @ w2 (into VMEM scratch).
       Phase 1: column max over rows of adj @ s2 (per row tile)."""
    p = pl.program_id(0)
    i = pl.program_id(1)
    r0 = pl.multiple_of(i * tile_rows, tile_rows)

    @pl.when(p == 0)
    def _phase_s2():
        a = adj_ref[pl.ds(r0, tile_rows), :]
        h1 = jnp.dot(a, s1_ref[...], preferred_element_type=jnp.float32)
        h1 = jnp.maximum(h1 + b1_ref[...], 0.0)
        # TODO(synk): F.dropout(training=self.training) is identity at inference.
        s2_ref[pl.ds(r0, tile_rows), :] = jnp.dot(
            h1.astype(w2_ref.dtype), w2_ref[...],
            preferred_element_type=jnp.float32).astype(s2_ref.dtype)
        # Placeholder so the output buffer content is defined; overwritten in
        # phase 1 (same output block is revisited).
        out_ref[...] = jnp.full(out_ref.shape, -jnp.inf, out_ref.dtype)

    @pl.when(p == 1)
    def _phase_max():
        a = adj_ref[pl.ds(r0, tile_rows), :]
        h2 = jnp.dot(a, s2_ref[...], preferred_element_type=jnp.float32)
        row = r0 + jax.lax.broadcasted_iota(jnp.int32, h2.shape, 0)
        h2 = jnp.where(row < n_valid, h2, -jnp.inf)
        out_ref[...] = jnp.broadcast_to(jnp.max(h2, axis=0, keepdims=True),
                                        out_ref.shape)


# --------------------------------------------------------------------------
# Wrapper
# --------------------------------------------------------------------------
def gcn_single_forward(x, adj, w1, b1, w2, b2, w3, b3, *,
                       use_bf16=True, force_two_pass=False,
                       tile_rows=None, tile_k=None):
    N, nfeat = x.shape
    nhid = w1.shape[1]
    nclass = w2.shape[1]
    assert adj.shape == (N, N)

    n_pad, tm, tk = _choose_tiles(N, tile_rows=tile_rows, tile_k=tile_k)
    h_pad = _round_up(nhid, 128)
    c_pad = _round_up(nclass, 128)
    n_row_tiles = n_pad // tm

    cdtype = jnp.bfloat16 if use_bf16 else jnp.float32
    itemsize = jnp.dtype(cdtype).itemsize
    hi_prec = jax.lax.Precision.HIGHEST

    # support1 = x @ w1 computed once (O(N*F*H) flops -- negligible vs N^2*H).
    s1 = jnp.dot(x.astype(jnp.float32), w1.astype(jnp.float32),
                 precision=hi_prec)
    s1_p = _pad2(s1, n_pad, h_pad).astype(cdtype)
    # Cast before padding so the N^2 pad copy is already half-width for bf16.
    adj_p = _pad2(adj.astype(cdtype), n_pad, n_pad)
    b1_p = _pad2(b1.astype(jnp.float32).reshape(1, -1), 1, h_pad)
    w2_p = _pad2(w2.astype(cdtype), h_pad, c_pad)

    # VMEM budget (v7x has only 64 MiB per TensorCore; v5e/v6e have 128 MiB).
    try:
        vmem_cap = int(pltpu.get_tpu_info().vmem_capacity_bytes)
    except Exception:
        vmem_cap = 64 * 1024 * 1024  # conservative default (v7x per-TC)
    vmem_limit = min(int(vmem_cap * 0.75), 100 * 1024 * 1024)

    adj_bytes = n_pad * n_pad * itemsize
    s1_bytes = n_pad * h_pad * itemsize
    s2_bytes = n_pad * c_pad * itemsize
    w2_bytes = h_pad * c_pad * itemsize
    out_bytes = 4 * 8 * n_row_tiles * c_pad

    # Fused-path residency estimate (2x inputs for possible double-buffering).
    fused_need = 2 * adj_bytes + 2 * s1_bytes + s2_bytes + 2 * w2_bytes + 2 * 4 * h_pad
    use_fused = (not force_two_pass) and fused_need <= int(0.5 * vmem_limit)

    if use_fused:
        compiler_params = pltpu.CompilerParams(
            dimension_semantics=("arbitrary", "arbitrary"),  # phase 1 needs all of phase 0's s2
            vmem_limit_bytes=vmem_limit)
        cost = pl.CostEstimate(
            flops=int(2 * n_pad * n_pad * h_pad
                      + 2 * n_pad * h_pad * c_pad
                      + 2 * n_pad * n_pad * c_pad),
            transcendentals=0,
            bytes_accessed=int(adj_bytes + s1_bytes + w2_bytes
                               + 4 * h_pad + out_bytes))
        tile_max = pl.pallas_call(
            functools.partial(_fused_kernel, n_valid=N, tile_rows=tm),
            out_shape=jax.ShapeDtypeStruct((8 * n_row_tiles, c_pad), jnp.float32),
            grid_spec=pltpu.PrefetchScalarGridSpec(
                num_scalar_prefetch=0,
                grid=(2, n_row_tiles),
                in_specs=[
                    pl.BlockSpec((n_pad, n_pad), lambda p, i: (0, 0)),   # adj (resident)
                    pl.BlockSpec((n_pad, h_pad), lambda p, i: (0, 0)),   # support1 (resident)
                    pl.BlockSpec((1, h_pad), lambda p, i: (0, 0)),       # b1 (resident)
                    pl.BlockSpec((h_pad, c_pad), lambda p, i: (0, 0)),   # w2 (resident)
                ],
                out_specs=pl.BlockSpec((8, c_pad), lambda p, i: (i, 0)),
                scratch_shapes=[pltpu.VMEM((n_pad, c_pad), cdtype)],      # s2 (VMEM only)
            ),
            compiler_params=compiler_params,
            cost_estimate=cost,
        )(adj_p, s1_p, b1_p, w2_p)
    else:
        compiler_params = pltpu.CompilerParams(
            dimension_semantics=("parallel", "arbitrary"),
            vmem_limit_bytes=vmem_limit)
        grid = (n_row_tiles, n_pad // tk)

        # ---- Pass 1: s2 = relu(adj @ support1 + b1) @ w2 ----
        cost1 = pl.CostEstimate(
            flops=int(2 * n_pad * n_pad * h_pad + 2 * n_pad * h_pad * c_pad),
            transcendentals=0,
            bytes_accessed=int(adj_bytes + s1_bytes + w2_bytes + 4 * h_pad
                               + s2_bytes))
        s2 = pl.pallas_call(
            functools.partial(_gc1_kernel, tk=tk),
            out_shape=jax.ShapeDtypeStruct((n_pad, c_pad), cdtype),
            grid_spec=pltpu.PrefetchScalarGridSpec(
                num_scalar_prefetch=0,
                grid=grid,
                in_specs=[
                    pl.BlockSpec((tm, tk), lambda i, k: (i, k)),         # adj tile
                    pl.BlockSpec((n_pad, h_pad), lambda i, k: (0, 0)),   # support1 (resident)
                    pl.BlockSpec((1, h_pad), lambda i, k: (0, 0)),       # b1 (resident)
                    pl.BlockSpec((h_pad, c_pad), lambda i, k: (0, 0)),   # w2 (resident)
                ],
                out_specs=pl.BlockSpec((tm, c_pad), lambda i, k: (i, 0)),
                scratch_shapes=[pltpu.VMEM((tm, h_pad), jnp.float32)],
            ),
            compiler_params=compiler_params,
            cost_estimate=cost1,
        )(adj_p, s1_p, b1_p, w2_p)

        # ---- Pass 2: fused adj @ s2 and node-axis max-pool (b2 in epilogue) ----
        cost2 = pl.CostEstimate(
            flops=int(2 * n_pad * n_pad * c_pad),
            transcendentals=0,
            bytes_accessed=int(adj_bytes + s2_bytes + out_bytes))
        tile_max = pl.pallas_call(
            functools.partial(_gc2_maxpool_kernel, tk=tk, n_valid=N, tile_rows=tm),
            out_shape=jax.ShapeDtypeStruct((8 * n_row_tiles, c_pad), jnp.float32),
            grid_spec=pltpu.PrefetchScalarGridSpec(
                num_scalar_prefetch=0,
                grid=grid,
                in_specs=[
                    pl.BlockSpec((tm, tk), lambda i, k: (i, k)),         # adj tile
                    pl.BlockSpec((n_pad, c_pad), lambda i, k: (0, 0)),   # s2 (resident)
                ],
                out_specs=pl.BlockSpec((8, c_pad), lambda i, k: (i, 0)),
                scratch_shapes=[pltpu.VMEM((tm, c_pad), jnp.float32)],
            ),
            compiler_params=compiler_params,
            cost_estimate=cost2,
        )(adj_p, s2)

    # ---- Epilogue: global max over row tiles, +b2, Linear(2, 1) (2 MACs) ----
    pooled = jnp.max(tile_max, axis=0)[:nclass]
    pooled = pooled + b2.astype(jnp.float32).reshape(-1)[:nclass]
    out = jnp.sum(pooled * w3.astype(jnp.float32).reshape(-1)) \
        + b3.astype(jnp.float32).reshape(-1)[0]
    return out.reshape(1, 1, 1)                                  # matches torch (1,1,1)


if __name__ == "__main__":
    # Small, deterministic synthetic setup (exercises padding + row masking).
    N, nfeat, nhid, nclass = 200, 48, 64, 2

    key = jax.random.PRNGKey(0)
    kx, kadj, kw1, kb1, kw2, kb2, kw3, kb3 = jax.random.split(key, 8)

    x = jax.random.normal(kx, (N, nfeat), dtype=jnp.float32)

    # Symmetric, row-normalized adjacency with self loops (dense).
    a = jax.random.uniform(kadj, (N, N), dtype=jnp.float32)
    a = (a + a.T) * 0.5 + jnp.eye(N, dtype=jnp.float32)
    adj = a / jnp.sum(a, axis=1, keepdims=True)

    w1 = jax.random.uniform(kw1, (nfeat, nhid), dtype=jnp.float32,
                            minval=-0.1, maxval=0.1)
    b1 = jax.random.uniform(kb1, (1, nhid), dtype=jnp.float32,
                            minval=-0.1, maxval=0.1)
    w2 = jax.random.uniform(kw2, (nhid, nclass), dtype=jnp.float32,
                            minval=-0.1, maxval=0.1)
    b2 = jax.random.uniform(kb2, (1, nclass), dtype=jnp.float32,
                            minval=-0.1, maxval=0.1)
    w3 = jax.random.uniform(kw3, (1, nclass), dtype=jnp.float32,
                            minval=-0.5, maxval=0.5)   # nn.Linear(2,1).weight
    b3 = jax.random.uniform(kb3, (1, 1), dtype=jnp.float32,
                            minval=-0.5, maxval=0.5)   # nn.Linear(2,1).bias

    # Pure-JAX reference of the same math (highest precision matmuls).
    P = jax.lax.Precision.HIGHEST
    support1 = jnp.dot(x, w1, precision=P)
    h1 = jnp.maximum(jnp.dot(adj, support1, precision=P) + b1, 0.0)
    h2 = jnp.dot(adj, jnp.dot(h1, w2, precision=P), precision=P) + b2
    ref = (jnp.dot(jnp.max(h2, axis=0, keepdims=True), w3.T, precision=P)
           + b3).reshape(1, 1, 1)

    run = functools.partial(gcn_single_forward, x, adj, w1, b1, w2, b2, w3, b3)

    # Default: fused small-N path, bf16 operands.
    out_fused_bf16 = jax.block_until_ready(run())
    # Fused path, f32 operands (tight validation).
    out_fused_f32 = jax.block_until_ready(run(use_bf16=False))
    # Large-N two-pass path forced, with a real K loop (2x2 grid), bf16 + f32.
    out_2p_bf16 = jax.block_until_ready(
        run(force_two_pass=True, tile_rows=128, tile_k=128))
    out_2p_f32 = jax.block_until_ready(
        run(force_two_pass=True, use_bf16=False, tile_rows=128, tile_k=128))

    assert out_fused_bf16.shape == (1, 1, 1)
    assert jnp.allclose(out_fused_f32, ref, atol=2e-3, rtol=2e-3), (out_fused_f32, ref)
    assert jnp.allclose(out_2p_f32, ref, atol=2e-3, rtol=2e-3), (out_2p_f32, ref)
    assert jnp.allclose(out_fused_bf16, ref, atol=3e-2, rtol=3e-2), (out_fused_bf16, ref)
    assert jnp.allclose(out_2p_bf16, ref, atol=3e-2, rtol=3e-2), (out_2p_bf16, ref)

    print("KERNEL_OK")
</pallas_src>

<mosaic_0001>
module attributes {stable_mosaic.version = 11 : i64} {
  func.func @_fused_kernel(%arg0: i32, %arg1: i32, %arg2: memref<256x256xbf16, #tpu.memory_space<vmem>>, %arg3: memref<256x128xbf16, #tpu.memory_space<vmem>>, %arg4: memref<1x128xf32, #tpu.memory_space<vmem>>, %arg5: memref<128x128xbf16, #tpu.memory_space<vmem>>, %arg6: memref<8x128xf32, #tpu.memory_space<vmem>>, %arg7: memref<256x128xbf16, #tpu.memory_space<vmem>>) attributes {dimension_semantics = [#tpu.dimension_semantics<arbitrary>, #tpu.dimension_semantics<arbitrary>], iteration_bounds = array<i64: 2, 2>, scalar_prefetch = 0 : i64, scratch_operands = 1 : i64, tpu.core_type = #tpu.core_type<tc>, window_params = [{pipeline_mode = #tpu.pipeline_mode<synchronous>, transform_indices = @transform_0, window_bounds = array<i64: 256, 256>}, {pipeline_mode = #tpu.pipeline_mode<synchronous>, transform_indices = @transform_1, window_bounds = array<i64: 256, 128>}, {pipeline_mode = #tpu.pipeline_mode<synchronous>, transform_indices = @transform_2, window_bounds = array<i64: 1, 128>}, {pipeline_mode = #tpu.pipeline_mode<synchronous>, transform_indices = @transform_3, window_bounds = array<i64: 128, 128>}, {transform_indices = @transform_4, window_bounds = array<i64: 8, 128>}]} {
    %c128_i32 = arith.constant 128 : i32
    %0 = arith.muli %arg1, %c128_i32 : i32
    %1 = tpu.assume_multiple %0, 128 : i32
    %c0_i32 = arith.constant 0 : i32
    %2 = arith.cmpi eq, %arg0, %c0_i32 : i32
    %3 = arith.extui %2 : i1 to i32
    %c0_i32_0 = arith.constant 0 : i32
    %4 = arith.cmpi ne, %3, %c0_i32_0 : i32
    scf.if %4 {
      %8 = arith.index_cast %1 : i32 to index
      %c0 = arith.constant 0 : index
      %9 = vector.load %arg2[%8, %c0] : memref<256x256xbf16, #tpu.memory_space<vmem>>, vector<128x256xbf16>
      %c0_2 = arith.constant 0 : index
      %c0_3 = arith.constant 0 : index
      %10 = vector.load %arg3[%c0_2, %c0_3] : memref<256x128xbf16, #tpu.memory_space<vmem>>, vector<256x128xbf16>
      %cst = arith.constant dense<0.000000e+00> : vector<128x128xf32>
      %11 = tpu.matmul %9, %10, %cst {dimension_numbers = #tpu.dot_dimension_numbers<[1], [0], [0], [1], [0, 0, 1, 1], [], []>} : vector<128x256xbf16>, vector<256x128xbf16>, vector<128x128xf32> -> vector<128x128xf32>
      %c0_4 = arith.constant 0 : index
      %c0_5 = arith.constant 0 : index
      %12 = vector.load %arg4[%c0_4, %c0_5] : memref<1x128xf32, #tpu.memory_space<vmem>>, vector<1x128xf32>
      %13 = vector.broadcast %12 : vector<1x128xf32> to vector<128x128xf32>
      %14 = arith.addf %11, %13 : vector<128x128xf32>
      %cst_6 = arith.constant 0.000000e+00 : f32
      %15 = vector.broadcast %cst_6 : f32 to vector<128x128xf32>
      %16 = arith.maximumf %14, %15 : vector<128x128xf32>
      %17 = arith.truncf %16 : vector<128x128xf32> to vector<128x128xbf16>
      %c0_7 = arith.constant 0 : index
      %c0_8 = arith.constant 0 : index
      %18 = vector.load %arg5[%c0_7, %c0_8] : memref<128x128xbf16, #tpu.memory_space<vmem>>, vector<128x128xbf16>
      %cst_9 = arith.constant dense<0.000000e+00> : vector<128x128xf32>
      %19 = tpu.matmul %17, %18, %cst_9 {dimension_numbers = #tpu.dot_dimension_numbers<[1], [0], [0], [1], [0, 0, 1, 1], [], []>} : vector<128x128xbf16>, vector<128x128xbf16>, vector<128x128xf32> -> vector<128x128xf32>
      %20 = arith.truncf %19 : vector<128x128xf32> to vector<128x128xbf16>
      %21 = arith.index_cast %1 : i32 to index
      %c0_10 = arith.constant 0 : index
      %22 = vector.load %arg7[%21, %c0_10] : memref<256x128xbf16, #tpu.memory_space<vmem>>, vector<128x128xbf16>
      tpu.vector_store %arg7[%21, %c0_10], %20 {strides = array<i32>} : memref<256x128xbf16, #tpu.memory_space<vmem>>, vector<128x128xbf16>,
      %cst_11 = arith.constant 0xFF800000 : f32
      %23 = vector.broadcast %cst_11 : f32 to vector<8x128xf32>
      %c0_12 = arith.constant 0 : index
      %c0_13 = arith.constant 0 : index
      %24 = vector.load %arg6[%c0_12, %c0_13] : memref<8x128xf32, #tpu.memory_space<vmem>>, vector<8x128xf32>
      tpu.vector_store %arg6[%c0_12, %c0_13], %23 {strides = array<i32>} : memref<8x128xf32, #tpu.memory_space<vmem>>, vector<8x128xf32>,
    } else {
    }
    %c1_i32 = arith.constant 1 : i32
    %5 = arith.cmpi eq, %arg0, %c1_i32 : i32
    %6 = arith.extui %5 : i1 to i32
    %c0_i32_1 = arith.constant 0 : i32
    %7 = arith.cmpi ne, %6, %c0_i32_1 : i32
    scf.if %7 {
      %8 = arith.index_cast %1 : i32 to index
      %c0 = arith.constant 0 : index
      %9 = vector.load %arg2[%8, %c0] : memref<256x256xbf16, #tpu.memory_space<vmem>>, vector<128x256xbf16>
      %c0_2 = arith.constant 0 : index
      %c0_3 = arith.constant 0 : index
      %10 = vector.load %arg7[%c0_2, %c0_3] : memref<256x128xbf16, #tpu.memory_space<vmem>>, vector<256x128xbf16>
      %cst = arith.constant dense<0.000000e+00> : vector<128x128xf32>
      %11 = tpu.matmul %9, %10, %cst {dimension_numbers = #tpu.dot_dimension_numbers<[1], [0], [0], [1], [0, 0, 1, 1], [], []>} : vector<128x256xbf16>, vector<256x128xbf16>, vector<128x128xf32> -> vector<128x128xf32>
      %12 = tpu.iota {dimensions = array<i32: 0>} : vector<128x128xi32>
      %13 = vector.broadcast %1 : i32 to vector<128x128xi32>
      %14 = arith.addi %13, %12 : vector<128x128xi32>
      %c200_i32 = arith.constant 200 : i32
      %15 = vector.broadcast %c200_i32 : i32 to vector<128x128xi32>
      %16 = arith.cmpi slt, %14, %15 : vector<128x128xi32>
      %cst_4 = arith.constant 0xFF800000 : f32
      %17 = vector.broadcast %cst_4 : f32 to vector<128x128xf32>
      %18 = arith.select %16, %11, %17 : vector<128x128xi1>, vector<128x128xf32>
      %cst_5 = arith.constant dense<0xFF800000> : vector<128xf32>
      %19 = vector.multi_reduction <maximumf>, %18, %cst_5 [0] : vector<128x128xf32> to vector<128xf32>
      %20 = vector.shape_cast %19 : vector<128xf32> to vector<1x128xf32>
      %21 = vector.shape_cast %20 : vector<1x128xf32> to vector<1x128xf32>
      %22 = vector.broadcast %21 : vector<1x128xf32> to vector<8x128xf32>
      %c0_6 = arith.constant 0 : index
      %c0_7 = arith.constant 0 : index
      %23 = vector.load %arg6[%c0_6, %c0_7] : memref<8x128xf32, #tpu.memory_space<vmem>>, vector<8x128xf32>
      tpu.vector_store %arg6[%c0_6, %c0_7], %22 {strides = array<i32>} : memref<8x128xf32, #tpu.memory_space<vmem>>, vector<8x128xf32>,
    } else {
    }
    return
  }
  func.func @transform_0(%arg0: i32, %arg1: i32) -> (i32, i32) {
    %c0_i32 = arith.constant 0 : i32
    %c0_i32_0 = arith.constant 0 : i32
    %c0_i32_1 = arith.constant 0 : i32
    return %c0_i32, %c0_i32_0 : i32, i32
  }
  func.func @transform_1(%arg0: i32, %arg1: i32) -> (i32, i32) {
    %c0_i32 = arith.constant 0 : i32
    %c0_i32_0 = arith.constant 0 : i32
    %c0_i32_1 = arith.constant 0 : i32
    return %c0_i32, %c0_i32_0 : i32, i32
  }
  func.func @transform_2(%arg0: i32, %arg1: i32) -> (i32, i32) {
    %c0_i32 = arith.constant 0 : i32
    %c0_i32_0 = arith.constant 0 : i32
    %c0_i32_1 = arith.constant 0 : i32
    return %c0_i32, %c0_i32_0 : i32, i32
  }
  func.func @transform_3(%arg0: i32, %arg1: i32) -> (i32, i32) {
    %c0_i32 = arith.constant 0 : i32
    %c0_i32_0 = arith.constant 0 : i32
    %c0_i32_1 = arith.constant 0 : i32
    return %c0_i32, %c0_i32_0 : i32, i32
  }
  func.func @transform_4(%arg0: i32, %arg1: i32) -> (i32, i32) {
    %c0_i32 = arith.constant 0 : i32
    %c0_i32_0 = arith.constant 0 : i32
    return %arg1, %c0_i32 : i32, i32
  }
}

</mosaic_0001>

<bundles_post_ra>
// kernel: tpu_custom_call.1
= control target key start
LH: loop header
LB: loop body
LE: loop exit
PB: predicated region body
PF: predicated region fallthrough
CT: control target
= control target key end

     0   :  { %9 = vsyncpa [#allocation4], 0  ;;  %s2511_s0 = inlined_call_operand.hbm [shape: bf16[256,256], index: 0, kind: input, shape index: {}]   ;;  %s2512_s1 = inlined_call_operand.hbm [shape: bf16[256,128], index: 1, kind: input, shape index: {}]   ;;  %s2513_s2 = inlined_call_operand.vmem [shape: f32[1,128], index: 2, kind: input, shape index: {}]   ;;  %s2514_s3 = inlined_call_operand.hbm [shape: bf16[128,128], index: 3, kind: input, shape index: {}]   ;;  %s2515_s4 = inlined_call_operand.hbm [shape: f32[16,128], index: 4, kind: output, shape index: {}]  }
   0x1   :  { %10 = vsyncpa [#allocation7], 0 }
   0x2   :  { %11 = vsyncpa [#allocation5], 0 }
   0x3   :  { %13 = vsyncpa [#allocation5 + $0x1], 0  ;;  %s2144_s15 = smov 0   ;;  %s2146_s16 = smov 0  }
   0x4   :  { %s2148_s17 = smov 0   ;;  %s2150_s18 = smov 0  }
   0x5   :  { %s2152_s19 = smov 0   ;;  %s2154_s20 = smov 0  }
   0x6   :  { %s2156_s21 = smov 0   ;;  %s2158_s22 = smov 0  }
   0x7 LB: > { %s1366_s23 = sadd.s32 4294967295, %s2108_s22   ;;  %s1367_s24 = sadd.s32 4294967294, %s2108_s22   ;;  %s2108_s22 = sphi %s2158_s22, %s19_s22   ;;  %s2104_s21 = sphi %s2156_s21, %s2529_s21   ;;  %s2100_s20 = sphi %s2154_s20, %s2528_s20   ;;  %s2096_s19 = sphi %s2152_s19, %s2527_s19   ;;  %s2092_s18 = sphi %s2150_s18, %s2526_s18   ;;  %s2088_s17 = sphi %s2148_s17, %s2525_s17   ;;  %s2084_s16 = sphi %s2146_s16, %s2524_s16   ;;  %s2080_s15 = sphi %s2144_s15, %s2523_s15  }
   0x8   : > { %s28_s25 = sadd.s32 1, %s2100_s20  ;;  %s31_s26 = sadd.s32 1, %s2104_s21 }
   0x9   : > { %p29_p0 = scmp.ge.s32.totalorder %s28_s25, 2  ;;  %s122_s27 = sadd.s32 1, %s2088_s17 }
   0xa   : > { %p132_p1 = scmp.ne.s32.totalorder %s2088_s17, %s2084_s16  ;;  %p133_p2 = scmp.eq.s32.totalorder %s1366_s23, 3 }
   0xb   : > { %s2531_s25 = smov (%p29_p0, %s28_s25), 0  ;;  %s2533_s26 = smov (!%p29_p0, %s31_s26), %s2104_s21 }
   0xc   : > { %s119_s28 = ssub.s32 %s2100_s20, %s2531_s25  ;;  %p2196_p3 = por %p133_p2, %p132_p1 }
   0xd   : > { %p33_p4 = scmp.ge.s32.totalorder %s2533_s26, 2  ;;  %p120_p5 = scmp.eq.s32.totalorder %s119_s28, 0 }
   0xe   : > { %p138_p6 = scmp.ne.s32.totalorder %s2084_s16, %s2080_s15  ;;  %p139_p7 = scmp.eq.s32.totalorder %s1367_s24, 3 }
   0xf   : > { %s2535_s26 = smov (%p33_p4, %s2533_s26), 0  ;;  %p1368_p9 = scmp.ge.s32.totalorder %s2108_s22, 1 }
  0x10   : > { %s2205_s30 = scalar_select %p120_p5, %s2088_s17, %s122_s27  }
  0x11   : > { %p2207_p8 = por %p139_p7, %p138_p6  ;;  %p146_p10 = scmp.lt.s32.totalorder %s2108_s22, 5 }
  0x12   : > { %p2213_p11 = scmp.eq.s32.totalorder %s1366_s23, 0  ;;  %s2110_s8 = smov [#allocation6]  }
  0x13   : > { %p2217_p12 = pnand %p1368_p9, %p146_p10  ;;  %s171_s9 = sshll.u32 %s2110_s8, 4  ;;  %s172_s9 = int_to_ptr.vmem [resolvable:$true] %s171_s9 }
  0x14   : > { %s2111_s11 = smov [#allocation3]   ;;  %s1941_s13 = scalar_lea.vmem %s172_s9, 2048 }
  0x15   : > { %p1749_p13 = pneg %p2217_p12  ;;  %s158_s12 = sshll.u32 %s2111_s11, 4  ;;  %s159_s12 = int_to_ptr.vmem [resolvable:$true] %s158_s12 }
  0x16   : > { %p1942_p2 = scmp.ne.s32.totalorder %s172_s9, %s1941_s13  ;;  %p1949_p6 = scmp.lt.s32.totalorder %s172_s9, %s172_s9 }
  0x17   : > { %p2225_p0 = pnand %p2213_p11, %p1749_p13  ;;  %p1950_p7 = scmp.lt.s32.totalorder %s1941_s13, %s1941_s13 }
  0x19   : > { %p1932_p1 = pneg %p2225_p0  ;;  %p1951_p9 = por %p1950_p7, %p1949_p6 }
  0x1b   : > { %p1944_p4 = pnand %p1942_p2, %p1932_p1 }
  0x1d   : > { %p1945_p5 = pneg %p1944_p4 }
  0x1f   : > { %p1952_p10 = pnand %p1951_p9, %p1945_p5 }
  0x21   : > { %1955 = shalt.err (!%p1952_p10)
}
  0x22   : > { %s2516_s14 = smov 64   ;;  %s2113_s23 = smov 4  }
  0x23   : > { %1755 = dma.hbm_to_vmem [thread:$0]  (!%p2225_p0), %s2512_s1, 2048, %s172_s9, [#allocation7], %s2516_s14, %s2516_s14, %s2113_s23  }
  0x24   : > { %s1967_s28 = scalar_lea.vmem %s159_s12, 4096  ;;  %p1975_p5 = scmp.lt.s32.totalorder %s159_s12, %s159_s12 }
  0x25   : > { %p1968_p13 = scmp.ne.s32.totalorder %s159_s12, %s1967_s28  ;;  %p1976_p6 = scmp.lt.s32.totalorder %s1967_s28, %s1967_s28 }
  0x27   : > { %p1970_p2 = pnand %p1968_p13, %p1932_p1  ;;  %p1977_p7 = por %p1976_p6, %p1975_p5 }
  0x29   : > { %p1971_p4 = pneg %p1970_p2 }
  0x2b   : > { %p1978_p9 = pnand %p1977_p7, %p1971_p4 }
  0x2d   : > { %1981 = shalt.err (!%p1978_p9)
}
  0x2e   : > { %s2114_s8 = smov 128   ;;  %s2115_s11 = smov 8  }
  0x2f   : > { %1752 = dma.hbm_to_vmem [thread:$0]  (!%p2225_p0), %s2511_s0, 4096, %s159_s12, [#allocation4], %s2114_s8, %s2114_s8, %s2115_s11  }
  0x30   : > { %s2116_s9 = smov [#allocation8]  }
  0x31   : > { %s187_s27 = sshll.u32 %s2116_s9, 4  ;;  %s188_s27 = int_to_ptr.vmem [resolvable:$true] %s187_s27 }
  0x32   : > { %s1993_s14 = scalar_lea.vmem %s188_s27, 1024  ;;  %p2001_p4 = scmp.lt.s32.totalorder %s188_s27, %s188_s27 }
  0x33   : > { %p1994_p10 = scmp.ne.s32.totalorder %s188_s27, %s1993_s14  ;;  %p2002_p5 = scmp.lt.s32.totalorder %s1993_s14, %s1993_s14 }
  0x35   : > { %p1996_p13 = pnand %p1994_p10, %p1932_p1  ;;  %p2003_p6 = por %p2002_p5, %p2001_p4 }
  0x37   : > { %p1997_p2 = pneg %p1996_p13 }
  0x39   : > { %p2004_p7 = pnand %p2003_p6, %p1997_p2 }
  0x3b   : > { %2007 = shalt.err (!%p2004_p7)
}
  0x3c   : > { %s2522_s28 = smov 64   ;;  %203 = sbr.rel (%p2217_p12) target bundleno = 886 (0x376), region = 36 }
  0x3d   : > { %1758 = dma.hbm_to_vmem [thread:$0]  (!%p2225_p0), %s2514_s3, 1024, %s188_s27, [#allocation7], %s2522_s28, %s2522_s28, %s2113_s23  }
  0x41   : > { %2067 = dma.done.wait (%p2213_p11), [#allocation4], 4096  }
  0x42   : > { %2069 = vsyncadd (%p2213_p11), [#allocation4], 4294963200 }
  0x43   : > { %2071 = dma.done.wait (%p2213_p11), [#allocation7], 3072  }
  0x44   : > { %2073 = vsyncadd (%p2213_p11), [#allocation7], 4294964224  ;;  %s229_s10 = sand.u32 1, %s2084_s16   ;;  %s2273_s14 = sshll.u32 %s2092_s18, 7 }
  0x45   : > { %s1376_s7 = sshll.u32 %s229_s10, 3  ;;  %p1378_p12 = scmp.ne.s32.totalorder %s2096_s19, 0 }
  0x46   : > { %s2277_s23 = scalar_lea.vmem [#allocation9], %s1376_s7  ;;  %s2281_s18 = scalar_lea.vmem (!%p1378_p12), [#allocation3], %s2273_s14 }
  0x47   : > { %237 = sbr.rel (%p1378_p12) target bundleno = 574 (0x23e), region = 52  ;;  %s238_s13 = sshra.s32 (!%p1378_p12), %s2273_s14, 3 }
  0x48   : > { %s1438_s24 = sshll.u32 (!%p1378_p12), %s238_s13, 2 }
  0x49   : > { %s821_s9 = scalar_lea.vmem (!%p1378_p12), [#allocation2], %s1438_s24 }
  0x4c   : > { %v1842_v0 = vld [vmem:[#allocation6 + $0x78] sm:$0xff]   ;;  %v1844_v2 = vld [vmem:[#allocation6 + $0x70] sm:$0xff]   ;;  %v1846_v4 = vld [vmem:[#allocation6 + $0x68] sm:$0xff]  }
  0x4d   : > { %v1843_v1 = vld [vmem:[#allocation6 + $0x38] sm:$0xff]   ;;  %1543 = vmatprep.subr.bf16.mxu0 %v1842_v0  ;;  %v1845_v3 = vld [vmem:[#allocation6 + $0x30] sm:$0xff]   ;;  %v1847_v5 = vld [vmem:[#allocation6 + $0x28] sm:$0xff]  }
  0x4e   : > { %1544 = vmatpush3.bf16.msra.mxu0 %v1843_v1  ;;  %v1848_v6 = vld [vmem:[#allocation6 + $0x60] sm:$0xff]   ;;  %v1850_v8 = vld [vmem:[#allocation6 + $0x58] sm:$0xff]   ;;  %v1852_v10 = vld [vmem:[#allocation6 + $0x50] sm:$0xff]  }
  0x4f   : > { %1545 = vmatprep.subr.bf16.mxu0 %v1844_v2  ;;  %v1849_v7 = vld [vmem:[#allocation6 + $0x20] sm:$0xff]   ;;  %v1851_v9 = vld [vmem:[#allocation6 + $0x18] sm:$0xff]   ;;  %v1853_v12 = vld [vmem:[#allocation6 + $0x10] sm:$0xff]  }
  0x50   : > { %v1860_v11 = vld [vmem:[%s2281_s18 + $0x4] ss:$8 sps:$4 sm:$0xff]   ;;  %v1882_v17 = vld [vmem:[#allocation8 + $0x38] sm:$0xff]   ;;  %v1858_v18 = vld [vmem:[%s2281_s18] ss:$8 sps:$4 sm:$0xff]  }
  0x51   : > { %506 = vmatprep.mubr.bf16.mxu0 %v1860_v11  ;;  %v1854_v13 = vld [vmem:[#allocation6 + $0x48] sm:$0xff]   ;;  %v1856_v15 = vld [vmem:[#allocation6 + $0x40] sm:$0xff]   ;;  %v1883_v19 = vld [vmem:[#allocation8 + $0x30] sm:$0xff]   ;;  %1687 = vmatprep.subr.bf16.mxu1 %v1882_v17 }
  0x52   : > { %1546 = vmatpush3.bf16.msra.mxu0 %v1845_v3  ;;  %v1855_v14 = vld [vmem:[#allocation6 + $0x8] sm:$0xff]   ;;  %v1857_v16 = vld [vmem:[#allocation6] sm:$0xff]   ;;  %v1861_v20 = vld [vmem:[%s2281_s18 + $0x14] ss:$8 sps:$4 sm:$0xff]   ;;  %1688 = vmatpush3.bf16.msra.mxu1 %v1882_v17 }
  0x53   : > { %1547 = vmatprep.subr.bf16.mxu0 %v1846_v4  ;;  %v1884_v21 = vld [vmem:[#allocation8 + $0x28] sm:$0xff]   ;;  %1689 = vmatprep.subr.bf16.mxu1 %v1883_v19  ;;  %v1863_v22 = vld [vmem:[%s2281_s18 + $0x10] ss:$8 sps:$4 sm:$0xff]   ;;  %v1867_v25 = vld [vmem:[%s2281_s18 + $0x34] ss:$8 sps:$4 sm:$0xff]  }
  0x54   : > { %v1864_v23 = vld [vmem:[%s2281_s18 + $0x24] ss:$8 sps:$4 sm:$0xff]   ;;  %v1866_v24 = vld [vmem:[%s2281_s18 + $0x20] ss:$8 sps:$4 sm:$0xff]   ;;  %v1869_v26 = vld [vmem:[%s2281_s18 + $0x30] ss:$8 sps:$4 sm:$0xff]  }
  0x55   : > { %v1870_v27 = vld [vmem:[%s2281_s18 + $0x44] ss:$8 sps:$4 sm:$0xff]   ;;  %v1872_v28 = vld [vmem:[%s2281_s18 + $0x40] ss:$8 sps:$4 sm:$0xff]   ;;  %v1873_v29 = vld [vmem:[%s2281_s18 + $0x54] ss:$8 sps:$4 sm:$0xff]  }
  0x56   : > { %1548 = vmatpush3.bf16.msra.mxu0 %v1847_v5  ;;  %1690 = vmatpush3.bf16.msra.mxu1 %v1883_v19  ;;  %v1875_v30 = vld [vmem:[%s2281_s18 + $0x50] ss:$8 sps:$4 sm:$0xff]   ;;  %v1876_v31 = vld [vmem:[%s2281_s18 + $0x64] ss:$8 sps:$4 sm:$0xff]   ;;  %v1878_v32 = vld [vmem:[%s2281_s18 + $0x60] ss:$8 sps:$4 sm:$0xff]  }
  0x57   : > { %1549 = vmatprep.subr.bf16.mxu0 %v1848_v6  ;;  %1691 = vmatprep.subr.bf16.mxu1 %v1884_v21  ;;  %v1879_v33 = vld [vmem:[%s2281_s18 + $0x74] ss:$8 sps:$4 sm:$0xff]   ;;  %v1881_v34 = vld [vmem:[%s2281_s18 + $0x70] ss:$8 sps:$4 sm:$0xff]   ;;  %v1885_v35 = vld [vmem:[#allocation8 + $0x20] sm:$0xff]  }
  0x58   : > { %v1886_v36 = vld [vmem:[#allocation8 + $0x18] sm:$0xff]   ;;  %v1887_v37 = vld [vmem:[#allocation8 + $0x10] sm:$0xff]   ;;  %v1888_v38 = vld [vmem:[#allocation8 + $0x8] sm:$0xff]  }
  0x59   : > { %v1889_v39 = vld [vmem:[#allocation8] sm:$0xff]  }
  0x5a   : > { %1550 = vmatpush3.bf16.msra.mxu0 %v1849_v7  ;;  %1692 = vmatpush3.bf16.msra.mxu1 %v1884_v21  ;;  %v2302_v44 = vld [vmem:[%s2513_s2] ss:$0 sm:$0xff] }
  0x5b   : > { %1551 = vmatprep.subr.bf16.mxu0 %v1850_v8  ;;  %1693 = vmatprep.subr.bf16.mxu1 %v1885_v35 }
  0x5e   : > { %1552 = vmatpush3.bf16.msra.mxu0 %v1851_v9  ;;  %1694 = vmatpush3.bf16.msra.mxu1 %v1885_v35 }
  0x5f   : > { %1553 = vmatprep.subr.bf16.mxu0 %v1852_v10  ;;  %1695 = vmatprep.subr.bf16.mxu1 %v1886_v36 }
  0x62   : > { %1554 = vmatpush3.bf16.msra.mxu0 %v1853_v12  ;;  %1696 = vmatpush3.bf16.msra.mxu1 %v1886_v36 }
  0x63   : > { %1555 = vmatprep.subr.bf16.mxu0 %v1854_v13  ;;  %1697 = vmatprep.subr.bf16.mxu1 %v1887_v37 }
  0x66   : > { %1556 = vmatpush3.bf16.msra.mxu0 %v1855_v14  ;;  %1698 = vmatpush3.bf16.msra.mxu1 %v1887_v37 }
  0x67   : > { %1557 = vmatprep.subr.bf16.mxu0 %v1856_v15  ;;  %1699 = vmatprep.subr.bf16.mxu1 %v1888_v38 }
  0x6a   : > { %1558 = vmatpush3.bf16.msra.mxu0 %v1857_v16  ;;  %1700 = vmatpush3.bf16.msra.mxu1 %v1888_v38 }
  0x6b   : > { %1701 = vmatprep.subr.bf16.mxu1 %v1889_v39 }
  0x6d   : > { %507 = vmatmul.mubr.bf16.vlgmr.msra.gmra.mxu0 %v1858_v18 }
  0x6e   : > { %514 = vmatprep.mubr.bf16.mxu0 %v1861_v20  ;;  %1702 = vmatpush3.bf16.msra.mxu1 %v1889_v39 }
  0x75   : > { %515 = vmatmul.mubr.bf16.gmra.mxu0 %v1863_v22 }
  0x76   : > { %522 = vmatprep.mubr.bf16.mxu0 %v1864_v23 }
  0x7d   : > { %523 = vmatmul.mubr.bf16.gmra.mxu0 %v1866_v24 }
  0x7e   : > { %530 = vmatprep.mubr.bf16.mxu0 %v1867_v25 }
  0x85   : > { %531 = vmatmul.mubr.bf16.gmra.mxu0 %v1869_v26 }
  0x86   : > { %538 = vmatprep.mubr.bf16.mxu0 %v1870_v27 }
  0x8d   : > { %539 = vmatmul.mubr.bf16.gmra.mxu0 %v1872_v28 }
  0x8e   : > { %546 = vmatprep.mubr.bf16.mxu0 %v1873_v29 }
  0x95   : > { %547 = vmatmul.mubr.bf16.gmra.mxu0 %v1875_v30 }
  0x96   : > { %554 = vmatprep.mubr.bf16.mxu0 %v1876_v31 }
  0x9d   : > { %555 = vmatmul.mubr.bf16.gmra.mxu0 %v1878_v32 }
  0x9e   : > { %562 = vmatprep.mubr.bf16.mxu0 %v1879_v33 }
  0xa5   : > { %563 = vmatmul.mubr.bf16.gmra.mxu0 %v1881_v34 }
 0x12d   : > { %v1559_v40 = vpop.f32.mrf.mxu0 }
 0x12f   : > { %v1560_v41 = vpop.f32.mrf.mxu0 }
 0x130   : > { %v1561_v42 = vadd.f32 %v1560_v41, %v1559_v40 }
 0x131   : > { %v1562_v43 = vpop.f32.mrf.mxu0 }
 0x132   : > { %v509_v47 = vadd.f32 %v1561_v42, %v2302_v44 }
 0x133   : > { %v1563_v45 = vpop.f32.mrf.mxu0 }
 0x134   : > { %v1564_v46 = vadd.f32 %v1563_v45, %v1562_v43  ;;  %v571_v52 = vmax.f32 %v509_v47, 0.0 }
 0x135   : > { %v1565_v48 = vpop.f32.mrf.mxu0 }
 0x136   : > { %v512_v49 = vadd.f32 %v1564_v46, %v2302_v44 }
 0x137   : > { %v1566_v50 = vpop.f32.mrf.mxu0 }
 0x138   : > { %v1567_v51 = vadd.f32 %v1566_v50, %v1565_v48  ;;  %v572_v53 = vmax.f32 %v512_v49, 0.0 }
 0x139   : > { %v1568_v54 = vpop.f32.mrf.mxu0 }
 0x13a   : > { %v587_v55 = vpack.c.bf16 %v572_v53, %v571_v52  ;;  %v517_v57 = vadd.f32 %v1567_v51, %v2302_v44 }
 0x13b   : > { %v1569_v56 = vpop.f32.mrf.mxu0 }
 0x13c   : > { %v1570_v58 = vadd.f32 %v1569_v56, %v1568_v54  ;;  %1703 = vmatprep.mubr.bf16.mxu1 %v587_v55  ;;  %v573_v62 = vmax.f32 %v517_v57, 0.0 }
 0x13d   : > { %v1571_v59 = vpop.f32.mrf.mxu0 }
 0x13e   : > { %v520_v60 = vadd.f32 %v1570_v58, %v2302_v44 }
 0x13f   : > { %v1572_v61 = vpop.f32.mrf.mxu0 }
 0x140   : > { %v574_v63 = vmax.f32 %v520_v60, 0.0  ;;  %v1573_v0 = vadd.f32 %v1572_v61, %v1571_v59 }
 0x141   : > { %v1574_v1 = vpop.f32.mrf.mxu0 }
 0x142   : > { %v588_v2 = vpack.c.bf16 %v574_v63, %v573_v62  ;;  %v525_v4 = vadd.f32 %v1573_v0, %v2302_v44 }
 0x143   : > { %v1575_v3 = vpop.f32.mrf.mxu0 }
 0x144   : > { %v1576_v5 = vadd.f32 %v1575_v3, %v1574_v1  ;;  %1704 = vmatmul.mubr.bf16.vlgmr.msra.gmra.mxu1 %v588_v2  ;;  %v575_v9 = vmax.f32 %v525_v4, 0.0  ;;  %v2117_v2 = vmov -inf  }
 0x145   : > { %v1577_v6 = vpop.f32.mrf.mxu0  ;;  %838 = vst [vmem:[%s2277_s23] sm:$0xff] %v2117_v2 }
 0x146   : > { %v528_v7 = vadd.f32 %v1576_v5, %v2302_v44 }
 0x147   : > { %v1578_v8 = vpop.f32.mrf.mxu0 }
 0x148   : > { %v576_v10 = vmax.f32 %v528_v7, 0.0  ;;  %v1579_v11 = vadd.f32 %v1578_v8, %v1577_v6 }
 0x149   : > { %v1580_v12 = vpop.f32.mrf.mxu0 }
 0x14a   : > { %v589_v13 = vpack.c.bf16 %v576_v10, %v575_v9  ;;  %v533_v15 = vadd.f32 %v1579_v11, %v2302_v44 }
 0x14b   : > { %v1581_v14 = vpop.f32.mrf.mxu0 }
 0x14c   : > { %v1582_v16 = vadd.f32 %v1581_v14, %v1580_v12  ;;  %1707 = vmatprep.mubr.bf16.mxu1 %v589_v13  ;;  %v577_v20 = vmax.f32 %v533_v15, 0.0 }
 0x14d   : > { %v1583_v17 = vpop.f32.mrf.mxu0 }
 0x14e   : > { %v536_v18 = vadd.f32 %v1582_v16, %v2302_v44 }
 0x14f   : > { %v1584_v19 = vpop.f32.mrf.mxu0 }
 0x150   : > { %v578_v21 = vmax.f32 %v536_v18, 0.0  ;;  %v1585_v22 = vadd.f32 %v1584_v19, %v1583_v17 }
 0x151   : > { %v1586_v23 = vpop.f32.mrf.mxu0 }
 0x152   : > { %v590_v24 = vpack.c.bf16 %v578_v21, %v577_v20  ;;  %v541_v26 = vadd.f32 %v1585_v22, %v2302_v44 }
 0x153   : > { %v1587_v25 = vpop.f32.mrf.mxu0 }
 0x154   : > { %v1588_v27 = vadd.f32 %v1587_v25, %v1586_v23  ;;  %1708 = vmatmul.mubr.bf16.gmra.mxu1 %v590_v24  ;;  %v579_v31 = vmax.f32 %v541_v26, 0.0 }
 0x155   : > { %v1589_v28 = vpop.f32.mrf.mxu0 }
 0x156   : > { %v544_v29 = vadd.f32 %v1588_v27, %v2302_v44 }
 0x157   : > { %v1590_v30 = vpop.f32.mrf.mxu0 }
 0x158   : > { %v580_v32 = vmax.f32 %v544_v29, 0.0  ;;  %v1591_v33 = vadd.f32 %v1590_v30, %v1589_v28 }
 0x159   : > { %v1592_v34 = vpop.f32.mrf.mxu0 }
 0x15a   : > { %v591_v35 = vpack.c.bf16 %v580_v32, %v579_v31  ;;  %v549_v37 = vadd.f32 %v1591_v33, %v2302_v44 }
 0x15b   : > { %v1593_v36 = vpop.f32.mrf.mxu0 }
 0x15c   : > { %v1594_v38 = vadd.f32 %v1593_v36, %v1592_v34  ;;  %1711 = vmatprep.mubr.bf16.mxu1 %v591_v35  ;;  %v581_v42 = vmax.f32 %v549_v37, 0.0 }
 0x15d   : > { %v1595_v39 = vpop.f32.mrf.mxu0 }
 0x15e   : > { %v552_v40 = vadd.f32 %v1594_v38, %v2302_v44 }
 0x15f   : > { %v1596_v41 = vpop.f32.mrf.mxu0 }
 0x160   : > { %v582_v43 = vmax.f32 %v552_v40, 0.0  ;;  %v1597_v45 = vadd.f32 %v1596_v41, %v1595_v39 }
 0x161   : > { %v1598_v46 = vpop.f32.mrf.mxu0 }
 0x162   : > { %v592_v47 = vpack.c.bf16 %v582_v43, %v581_v42  ;;  %v557_v49 = vadd.f32 %v1597_v45, %v2302_v44 }
 0x163   : > { %v1599_v48 = vpop.f32.mrf.mxu0 }
 0x164   : > { %v1600_v50 = vadd.f32 %v1599_v48, %v1598_v46  ;;  %1712 = vmatmul.mubr.bf16.gmra.mxu1 %v592_v47  ;;  %v583_v54 = vmax.f32 %v557_v49, 0.0 }
 0x165   : > { %v1601_v51 = vpop.f32.mrf.mxu0 }
 0x166   : > { %v560_v52 = vadd.f32 %v1600_v50, %v2302_v44 }
 0x167   : > { %v1602_v53 = vpop.f32.mrf.mxu0 }
 0x168   : > { %v584_v55 = vmax.f32 %v560_v52, 0.0  ;;  %v1603_v56 = vadd.f32 %v1602_v53, %v1601_v51 }
 0x169   : > { %v1604_v57 = vpop.f32.mrf.mxu0 }
 0x16a   : > { %v593_v58 = vpack.c.bf16 %v584_v55, %v583_v54  ;;  %v565_v60 = vadd.f32 %v1603_v56, %v2302_v44 }
 0x16b   : > { %v1605_v59 = vpop.f32.mrf.mxu0 }
 0x16c   : > { %v1606_v61 = vadd.f32 %v1605_v59, %v1604_v57  ;;  %1715 = vmatprep.mubr.bf16.mxu1 %v593_v58  ;;  %v585_v63 = vmax.f32 %v565_v60, 0.0 }
 0x16e   : > { %v568_v62 = vadd.f32 %v1606_v61, %v2302_v44 }
 0x170   : > { %v586_v0 = vmax.f32 %v568_v62, 0.0 }
 0x172   : > { %v594_v1 = vpack.c.bf16 %v586_v0, %v585_v63 }
 0x174   : > { %1716 = vmatmul.mubr.bf16.gmra.mxu1 %v594_v1 }
 0x204   : > { %v1705_v3 = vpop.f32.mrf.mxu1 }
 0x206   : > { %v693_v4 = vpop.f32.mrf.mxu1 }
 0x208   : > { %v1706_v5 = vpop.f32.mrf.mxu1 }
 0x209   : > { %v1504_v6 = vpack.c.bf16 %v1706_v5, %v1705_v3 }
 0x20a   : > { %v696_v7 = vpop.f32.mrf.mxu1 }
 0x20b   : > { %1536 = vst [vmem:[%s821_s9 + $0x8] sm:$0xff] %v1504_v6   ;;  %v1499_v8 = vpack.c.bf16 %v696_v7, %v693_v4 }
 0x20d   : > { %1500 = vst [vmem:[%s821_s9] sm:$0xff] %v1499_v8  }
 0x214   : > { %v1709_v9 = vpop.f32.mrf.mxu1 }
 0x216   : > { %v709_v10 = vpop.f32.mrf.mxu1 }
 0x218   : > { %v1710_v44 = vpop.f32.mrf.mxu1 }
 0x219   : > { %v1514_v11 = vpack.c.bf16 %v1710_v44, %v1709_v9 }
 0x21a   : > { %v712_v12 = vpop.f32.mrf.mxu1 }
 0x21b   : > { %1538 = vst [vmem:[%s821_s9 + $0x18] sm:$0xff] %v1514_v11   ;;  %v1509_v13 = vpack.c.bf16 %v712_v12, %v709_v10 }
 0x21d   : > { %1537 = vst [vmem:[%s821_s9 + $0x10] sm:$0xff] %v1509_v13  }
 0x224   : > { %v1713_v14 = vpop.f32.mrf.mxu1 }
 0x226   : > { %v725_v15 = vpop.f32.mrf.mxu1 }
 0x228   : > { %v1714_v16 = vpop.f32.mrf.mxu1 }
 0x229   : > { %v1524_v17 = vpack.c.bf16 %v1714_v16, %v1713_v14 }
 0x22a   : > { %v728_v18 = vpop.f32.mrf.mxu1 }
 0x22b   : > { %1540 = vst [vmem:[%s821_s9 + $0x28] sm:$0xff] %v1524_v17   ;;  %v1519_v19 = vpack.c.bf16 %v728_v18, %v725_v15 }
 0x22d   : > { %1539 = vst [vmem:[%s821_s9 + $0x20] sm:$0xff] %v1519_v19  }
 0x234   : > { %v1717_v20 = vpop.f32.mrf.mxu1 }
 0x236   : > { %v741_v21 = vpop.f32.mrf.mxu1 }
 0x238   : > { %v1718_v22 = vpop.f32.mrf.mxu1 }
 0x239   : > { %v1534_v23 = vpack.c.bf16 %v1718_v22, %v1717_v20 }
 0x23a   : > { %v744_v24 = vpop.f32.mrf.mxu1 }
 0x23b   : > { %1542 = vst [vmem:[%s821_s9 + $0x38] sm:$0xff] %v1534_v23   ;;  %v1529_v25 = vpack.c.bf16 %v744_v24, %v741_v21 }
 0x23d   : > { %1541 = vst [vmem:[%s821_s9 + $0x30] sm:$0xff] %v1529_v25  }
 0x23e PF: > { %p1439_p11 = scmp.ne.s32.totalorder %s2096_s19, 1 }
 0x23f   : > { %s2324_s19 = scalar_lea.vmem (!%p1439_p11), [#allocation3], %s2273_s14 }
 0x240   : > { %842 = sbr.rel (%p1439_p11) target bundleno = 863 (0x35f), region = 56 }
 0x245   : > { %v1890_v26 = vld [vmem:[#allocation2 + $0x78] sm:$0xff]   ;;  %v1892_v28 = vld [vmem:[#allocation2 + $0x70] sm:$0xff]   ;;  %v1894_v30 = vld [vmem:[#allocation2 + $0x68] sm:$0xff]   ;;  %v1169_v1 = vlaneseq  ;;  %v2361_v9 = vstv %s2273_s14 }
 0x246   : > { %v1891_v27 = vld [vmem:[#allocation2 + $0x38] sm:$0xff]   ;;  %1623 = vmatprep.subr.bf16.mxu0 %v1890_v26  ;;  %1719 = vmatprep.subr.bf16.mxu1 %v1890_v26  ;;  %v1893_v29 = vld [vmem:[#allocation2 + $0x30] sm:$0xff]   ;;  %v1895_v31 = vld [vmem:[#allocation2 + $0x28] sm:$0xff]  }
 0x247   : > { %1624 = vmatpush3.bf16.msra.mxu0 %v1891_v27  ;;  %1727 = vmatpush3.bf16.msra.mxu1 %v1891_v27  ;;  %v1896_v32 = vld [vmem:[#allocation2 + $0x60] sm:$0xff]   ;;  %v1898_v34 = vld [vmem:[#allocation2 + $0x58] sm:$0xff]   ;;  %v1900_v36 = vld [vmem:[#allocation2 + $0x50] sm:$0xff]   ;;  %v2356_v6 = vshrl.u32 %v1169_v1, 7 }
 0x248   : > { %1625 = vmatprep.subr.bf16.mxu0 %v1892_v28  ;;  %1720 = vmatprep.subr.bf16.mxu1 %v1892_v28  ;;  %v1897_v33 = vld [vmem:[#allocation2 + $0x20] sm:$0xff]   ;;  %v1899_v35 = vld [vmem:[#allocation2 + $0x18] sm:$0xff]   ;;  %v1901_v39 = vld [vmem:[#allocation2 + $0x10] sm:$0xff]  }
 0x249   : > { %v1908_v37 = vld [vmem:[%s2324_s19 + $0x4] ss:$8 sps:$4 sm:$0xff]   ;;  %v1906_v45 = vld [vmem:[%s2324_s19] ss:$8 sps:$4 sm:$0xff]   ;;  %v1912_v47 = vld [vmem:[%s2324_s19 + $0x14] ss:$8 sps:$4 sm:$0xff]   ;;  %v2377_v17 = vadd.s32 %v2361_v9, %v2356_v6 }
 0x24a   : > { %v1911_v38 = vld [vmem:[%s2324_s19 + $0x44] ss:$8 sps:$4 sm:$0xff]   ;;  %1104 = vmatprep.mubr.bf16.mxu0 %v1908_v37  ;;  %v1909_v46 = vld [vmem:[%s2324_s19 + $0x40] ss:$8 sps:$4 sm:$0xff]   ;;  %v1914_v48 = vld [vmem:[%s2324_s19 + $0x54] ss:$8 sps:$4 sm:$0xff]  }
 0x24b   : > { %1626 = vmatpush3.bf16.msra.mxu0 %v1893_v29  ;;  %1728 = vmatpush3.bf16.msra.mxu1 %v1893_v29  ;;  %v1902_v40 = vld [vmem:[#allocation2 + $0x48] sm:$0xff]   ;;  %v1904_v42 = vld [vmem:[#allocation2 + $0x40] sm:$0xff]   ;;  %v1916_v49 = vld [vmem:[%s2324_s19 + $0x10] ss:$8 sps:$4 sm:$0xff]   ;;  %v1178_v11 = vadd.s32 64, %v2356_v6  ;;  %v1171_v12 = vadd.s32 8, %v2356_v6 }
 0x24c   : > { %1627 = vmatprep.subr.bf16.mxu0 %v1894_v30  ;;  %1721 = vmatprep.subr.bf16.mxu1 %v1894_v30  ;;  %v1903_v41 = vld [vmem:[#allocation2 + $0x8] sm:$0xff]   ;;  %v1905_v43 = vld [vmem:[#allocation2] sm:$0xff]   ;;  %v1917_v50 = vld [vmem:[%s2324_s19 + $0x50] ss:$8 sps:$4 sm:$0xff]   ;;  %v1179_v13 = vadd.s32 72, %v2356_v6  ;;  %v1175_v16 = vadd.s32 40, %v2356_v6 }
 0x24d   : > { %1136 = vmatprep.mubr.bf16.mxu1 %v1911_v38  ;;  %v1918_v51 = vld [vmem:[%s2324_s19 + $0x24] ss:$8 sps:$4 sm:$0xff]   ;;  %v1922_v53 = vld [vmem:[%s2324_s19 + $0x20] ss:$8 sps:$4 sm:$0xff]   ;;  %v1924_v55 = vld [vmem:[%s2324_s19 + $0x34] ss:$8 sps:$4 sm:$0xff]   ;;  %v2387_v25 = vadd.s32 %v2361_v9, %v1178_v11  ;;  %v1188_v26 = vadd.s32 %v2361_v9, %v1171_v12 }
 0x24e   : > { %v1920_v52 = vld [vmem:[%s2324_s19 + $0x64] ss:$8 sps:$4 sm:$0xff]   ;;  %v1923_v54 = vld [vmem:[%s2324_s19 + $0x60] ss:$8 sps:$4 sm:$0xff]   ;;  %v1926_v56 = vld [vmem:[%s2324_s19 + $0x74] ss:$8 sps:$4 sm:$0xff]   ;;  %v2391_v27 = vadd.s32 %v2361_v9, %v1179_v13 }
 0x24f   : > { %1628 = vmatpush3.bf16.msra.mxu0 %v1895_v31  ;;  %1729 = vmatpush3.bf16.msra.mxu1 %v1895_v31  ;;  %v1928_v57 = vld [vmem:[%s2324_s19 + $0x30] ss:$8 sps:$4 sm:$0xff]   ;;  %v1172_v18 = vadd.s32 16, %v2356_v6  ;;  %v1180_v19 = vadd.s32 80, %v2356_v6  ;;  %v1173_v20 = vadd.s32 24, %v2356_v6  ;;  %v1181_v21 = vadd.s32 88, %v2356_v6 }
 0x250   : > { %1629 = vmatprep.subr.bf16.mxu0 %v1896_v32  ;;  %1722 = vmatprep.subr.bf16.mxu1 %v1896_v32  ;;  %v1929_v58 = vld [vmem:[%s2324_s19 + $0x70] ss:$8 sps:$4 sm:$0xff]   ;;  %v1174_v24 = vadd.s32 32, %v2356_v6  ;;  %v1182_v28 = vadd.s32 96, %v2356_v6  ;;  %v1192_v31 = vadd.s32 %v2361_v9, %v1175_v16  ;;  %v1183_v32 = vadd.s32 104, %v2356_v6 }
 0x251   : > { %vm1203_vm0 = vcmp.lt.s32.totalorder %v2377_v17, 200  ;;  %v2408_v37 = vadd.s32 %v2361_v9, %v1181_v21  ;;  %vm1211_vm1 = vcmp.lt.s32.totalorder %v2387_v25, 200  ;;  %vm1204_vm2 = vcmp.lt.s32.totalorder %v1188_v26, 200 }
 0x252   : > { %v1191_v38 = vadd.s32 %v2361_v9, %v1174_v24  ;;  %vm1212_vm3 = vcmp.lt.s32.totalorder %v2391_v27, 200  ;;  %vm1208_vm4 = vcmp.lt.s32.totalorder %v1192_v31, 200 }
 0x253   : > { %1630 = vmatpush3.bf16.msra.mxu0 %v1897_v33  ;;  %1730 = vmatpush3.bf16.msra.mxu1 %v1897_v33  ;;  %v1176_v33 = vadd.s32 48, %v2356_v6  ;;  %vm1214_vm8 = vcmp.lt.s32.totalorder %v2408_v37, 200 }
 0x254   : > { %1631 = vmatprep.subr.bf16.mxu0 %v1898_v34  ;;  %1723 = vmatprep.subr.bf16.mxu1 %v1898_v34  ;;  %v1189_v34 = vadd.s32 %v2361_v9, %v1172_v18  ;;  %vm1207_vm9 = vcmp.lt.s32.totalorder %v1191_v38, 200 }
 0x256   : > { %vm1205_vm5 = vcmp.lt.s32.totalorder %v1189_v34, 200 }
 0x257   : > { %1632 = vmatpush3.bf16.msra.mxu0 %v1899_v35  ;;  %1731 = vmatpush3.bf16.msra.mxu1 %v1899_v35  ;;  %v2402_v35 = vadd.s32 %v2361_v9, %v1180_v19 }
 0x258   : > { %1633 = vmatprep.subr.bf16.mxu0 %v1900_v36  ;;  %1724 = vmatprep.subr.bf16.mxu1 %v1900_v36  ;;  %v2405_v36 = vadd.s32 %v2361_v9, %v1173_v20 }
 0x259   : > { %vm1213_vm6 = vcmp.lt.s32.totalorder %v2402_v35, 200 }
 0x25a   : > { %vm1206_vm7 = vcmp.lt.s32.totalorder %v2405_v36, 200 }
 0x25b   : > { %1634 = vmatpush3.bf16.msra.mxu0 %v1901_v39  ;;  %1732 = vmatpush3.bf16.msra.mxu1 %v1901_v39 }
 0x25c   : > { %1635 = vmatprep.subr.bf16.mxu0 %v1902_v40  ;;  %1725 = vmatprep.subr.bf16.mxu1 %v1902_v40 }
 0x25f   : > { %1636 = vmatpush3.bf16.msra.mxu0 %v1903_v41  ;;  %1733 = vmatpush3.bf16.msra.mxu1 %v1903_v41  ;;  %v2414_v41 = vadd.s32 %v2361_v9, %v1182_v28 }
 0x260   : > { %1637 = vmatprep.subr.bf16.mxu0 %v1904_v42  ;;  %1726 = vmatprep.subr.bf16.mxu1 %v1904_v42  ;;  %v1184_v42 = vadd.s32 112, %v2356_v6 }
 0x261   : > { %vm1215_vm10 = vcmp.lt.s32.totalorder %v2414_v41, 200 }
 0x263   : > { %1638 = vmatpush3.bf16.msra.mxu0 %v1905_v43  ;;  %1734 = vmatpush3.bf16.msra.mxu1 %v1905_v43 }
 0x266   : > { %1105 = vmatmul.mubr.bf16.vlgmr.msra.gmra.mxu0 %v1906_v45  ;;  %1137 = vmatmul.mubr.bf16.vlgmr.msra.gmra.mxu1 %v1909_v46  ;;  %v1200_v46 = vadd.s32 %v2361_v9, %v1183_v32 }
 0x267   : > { %1112 = vmatprep.mubr.bf16.mxu0 %v1912_v47  ;;  %1144 = vmatprep.mubr.bf16.mxu1 %v1914_v48  ;;  %v1193_v47 = vadd.s32 %v2361_v9, %v1176_v33  ;;  %v1177_v48 = vadd.s32 56, %v2356_v6 }
 0x268   : > { %vm1216_vm11 = vcmp.lt.s32.totalorder %v1200_v46, 200 }
 0x269   : > { %vm1209_vm12 = vcmp.lt.s32.totalorder %v1193_v47, 200  ;;  %v1194_v1 = vadd.s32 %v2361_v9, %v1177_v48 }
 0x26b   : > { %vm1210_vm14 = vcmp.lt.s32.totalorder %v1194_v1, 200 }
 0x26e   : > { %1113 = vmatmul.mubr.bf16.gmra.mxu0 %v1916_v49  ;;  %1145 = vmatmul.mubr.bf16.gmra.mxu1 %v1917_v50 }
 0x26f   : > { %1120 = vmatprep.mubr.bf16.mxu0 %v1918_v51  ;;  %1152 = vmatprep.mubr.bf16.mxu1 %v1920_v52 }
 0x276   : > { %1121 = vmatmul.mubr.bf16.gmra.mxu0 %v1922_v53  ;;  %1153 = vmatmul.mubr.bf16.gmra.mxu1 %v1923_v54 }
 0x277   : > { %1128 = vmatprep.mubr.bf16.mxu0 %v1924_v55  ;;  %1160 = vmatprep.mubr.bf16.mxu1 %v1926_v56 }
 0x27e   : > { %1129 = vmatmul.mubr.bf16.gmra.mxu0 %v1928_v57  ;;  %1161 = vmatmul.mubr.bf16.gmra.mxu1 %v1929_v58  ;;  %v1201_v57 = vadd.s32 %v2361_v9, %v1184_v42 }
 0x280   : > { %vm1217_vm13 = vcmp.lt.s32.totalorder %v1201_v57, 200 }
 0x326   : > { %v2342_v59 = vpop.f32.mrf.mxu0  ;;  %v2344_v60 = vpop.f32.mrf.mxu1 }
 0x328   : > { %v2346_v61 = vpop.f32.mrf.mxu0  ;;  %v2348_v62 = vpop.f32.mrf.mxu1 }
 0x329   : > { %v1641_v54 = vadd.f32 %v2346_v61, %v2342_v59 }
 0x32a   : > { %v1642_v63 = vpop.f32.mrf.mxu0  ;;  %v2350_v0 = vpop.f32.mrf.mxu1 }
 0x32b   : > { %v1219_v19 = vsel %vm1203_vm0, %v1641_v54, -inf }
 0x32c   : > { %v1643_v2 = vpop.f32.mrf.mxu0  ;;  %v2352_v3 = vpop.f32.mrf.mxu1 }
 0x32d   : > { %v1644_v49 = vadd.f32 %v1643_v2, %v1642_v63  ;;  %v1185_v2 = vadd.s32 120, %v2356_v6  ;;  %v1668_v59 = vadd.f32 %v2352_v3, %v2350_v0 }
 0x32e   : > { %v1645_v4 = vpop.f32.mrf.mxu0  ;;  %v2354_v5 = vpop.f32.mrf.mxu1 }
 0x32f   : > { %v1220_v11 = vsel %vm1204_vm2, %v1644_v49, -inf }
 0x330   : > { %v1646_v7 = vpop.f32.mrf.mxu0  ;;  %v2358_v8 = vpop.f32.mrf.mxu1 }
 0x331   : > { %v1647_v55 = vadd.f32 %v1646_v7, %v1645_v4  ;;  %v1665_v7 = vadd.f32 %v2348_v62, %v2344_v60  ;;  %v1671_v12 = vadd.f32 %v2358_v8, %v2354_v5  ;;  %v1202_v5 = vadd.s32 %v2361_v9, %v1185_v2 }
 0x332   : > { %v2363_v10 = vpop.f32.mrf.mxu0  ;;  %v2365_v44 = vpop.f32.mrf.mxu1  ;;  %v1228_v8 = vsel %vm1212_vm3, %v1668_v59, -inf }
 0x333   : > { %v1221_v0 = vsel %vm1205_vm5, %v1647_v55, -inf  ;;  %v1229_v24 = vsel %vm1213_vm6, %v1671_v12, -inf  ;;  %vm1218_vm15 = vcmp.lt.s32.totalorder %v1202_v5, 200 }
 0x334   : > { %v2370_v14 = vpop.f32.mrf.mxu0  ;;  %v2372_v15 = vpop.f32.mrf.mxu1 }
 0x335   : > { %v1650_v13 = vadd.f32 %v2370_v14, %v2363_v10  ;;  %v1674_v10 = vadd.f32 %v2372_v15, %v2365_v44 }
 0x336   : > { %v1651_v22 = vpop.f32.mrf.mxu0  ;;  %v2383_v23 = vpop.f32.mrf.mxu1 }
 0x337   : > { %v1222_v26 = vsel %vm1206_vm7, %v1650_v13, -inf  ;;  %v1230_v25 = vsel %vm1214_vm8, %v1674_v10, -inf }
 0x338   : > { %v1652_v29 = vpop.f32.mrf.mxu0  ;;  %v2394_v30 = vpop.f32.mrf.mxu1 }
 0x339   : > { %v1653_v50 = vadd.f32 %v1652_v29, %v1651_v22  ;;  %v1227_v22 = vsel %vm1211_vm1, %v1665_v7, -inf  ;;  %v1677_v9 = vadd.f32 %v2394_v30, %v2383_v23 }
 0x33a   : > { %v1654_v39 = vpop.f32.mrf.mxu0  ;;  %v1678_v40 = vpop.f32.mrf.mxu1 }
 0x33b   : > { %v1223_v61 = vsel %vm1207_vm9, %v1653_v50, -inf  ;;  %v1231_v36 = vsel %vm1215_vm10, %v1677_v9, -inf }
 0x33c   : > { %v1655_v43 = vpop.f32.mrf.mxu0  ;;  %v1679_v45 = vpop.f32.mrf.mxu1  ;;  %v1235_v20 = vmax.f32 %v1219_v19, %v1223_v61 }
 0x33d   : > { %v1656_v51 = vadd.f32 %v1655_v43, %v1654_v39  ;;  %v1680_v14 = vadd.f32 %v1679_v45, %v1678_v40 }
 0x33e   : > { %v1657_v52 = vpop.f32.mrf.mxu0  ;;  %v1681_v53 = vpop.f32.mrf.mxu1  ;;  %v1239_v32 = vmax.f32 %v1235_v20, %v1227_v22 }
 0x33f   : > { %v1224_v56 = vsel %vm1208_vm4, %v1656_v51, -inf  ;;  %v1232_v33 = vsel %vm1216_vm11, %v1680_v14, -inf }
 0x340   : > { %v1658_v58 = vpop.f32.mrf.mxu0  ;;  %v1682_v63 = vpop.f32.mrf.mxu1  ;;  %v1236_v16 = vmax.f32 %v1220_v11, %v1224_v56  ;;  %v1243_v38 = vmax.f32 %v1239_v32, %v1231_v36 }
 0x341   : > { %v1659_v4 = vadd.f32 %v1658_v58, %v1657_v52  ;;  %v1683_v27 = vadd.f32 %v1682_v63, %v1681_v53 }
 0x342   : > { %v1660_v18 = vpop.f32.mrf.mxu0  ;;  %v1684_v6 = vpop.f32.mrf.mxu1  ;;  %v1240_v28 = vmax.f32 %v1236_v16, %v1228_v8 }
 0x343   : > { %v1225_v3 = vsel %vm1209_vm12, %v1659_v4, -inf  ;;  %v1233_v23 = vsel %vm1217_vm13, %v1683_v27, -inf }
 0x344   : > { %v1237_v21 = vmax.f32 %v1221_v0, %v1225_v3  ;;  %v1661_v60 = vpop.f32.mrf.mxu0  ;;  %v1685_v62 = vpop.f32.mrf.mxu1  ;;  %v1244_v34 = vmax.f32 %v1240_v28, %v1232_v33 }
 0x345   : > { %v1662_v17 = vadd.f32 %v1661_v60, %v1660_v18  ;;  %v1686_v31 = vadd.f32 %v1685_v62, %v1684_v6 }
 0x346   : > { %v1241_v44 = vmax.f32 %v1237_v21, %v1229_v24  ;;  %v1247_v42 = vmax.f32 %v1243_v38, %v1244_v34 }
 0x347   : > { %v1226_v29 = vsel %vm1210_vm14, %v1662_v17, -inf  ;;  %v1234_v30 = vsel %vm1218_vm15, %v1686_v31, -inf }
 0x348   : > { %v1238_v15 = vmax.f32 %v1222_v26, %v1226_v29  ;;  %v1245_v39 = vmax.f32 %v1241_v44, %v1233_v23 }
 0x34a   : > { %v1242_v35 = vmax.f32 %v1238_v15, %v1230_v25 }
 0x34c   : > { %v1246_v40 = vmax.f32 %v1242_v35, %v1234_v30 }
 0x34e   : > { %v1248_v43 = vmax.f32 %v1245_v39, %v1246_v40 }
 0x350   : > { %v1249_v45 = vmax.f32 %v1247_v42, %v1248_v43 }
 0x352   : > { %v1250_v47 = vrot.slane %v1249_v45, 4 }
 0x354   : > { %v1251_v37 = vmax.f32 %v1249_v45, %v1250_v47 }
 0x356   : > { %v1252_v48 = vrot.slane %v1251_v37, 2 }
 0x358   : > { %v1253_v46 = vmax.f32 %v1251_v37, %v1252_v48 }
 0x35a   : > { %v1254_v49 = vrot.slane %v1253_v46, 1 }
 0x35c   : > { %v1255_v50 = vmax.f32 %v1253_v46, %v1254_v49 }
 0x35e   : > { %1256 = vst [vmem:[%s2277_s23] sm:$0xff] %v1255_v50 }
 0x35f PF: > { %s1269_s12 = scalar_lea.hbm %s2515_s4, %s2273_s14  ;;  %s1271_s8 = sshll.u32 %s2277_s23, 4  ;;  %s1272_s8 = int_to_ptr.vmem [resolvable:$true] %s1271_s8 }
 0x360   : > { %s1258_s7 = scalar_lea.sflag [#allocation5], %s229_s10  ;;  %s2008_s18 = scalar_lea.vmem %s1272_s8, 128 }
 0x361   : > { %p2009_p0 = scmp.ne.s32.totalorder %s1272_s8, %s2008_s18  ;;  %s2118_s6 = smov [#allocation9]  }
 0x362   : > { %s2012_s11 = sshll.u32 %s2118_s6, 4  ;;  %s2013_s11 = int_to_ptr.vmem [resolvable:$false] %s2012_s11 }
 0x363   : > { %p2010_p1 = pnand %p2009_p0, %p2196_p3  ;;  %s2014_s13 = scalar_lea.vmem %s2013_s11, 256 }
 0x364   : > { %p2015_p10 = scmp.lt.s32.totalorder %s1272_s8, %s2013_s11  ;;  %p2016_p13 = scmp.lt.s32.totalorder %s2014_s13, %s2008_s18 }
 0x365   : > { %p2011_p9 = pneg %p2010_p1 }
 0x366   : > { %p2017_p2 = por %p2016_p13, %p2015_p10 }
 0x368   : > { %p2018_p4 = pnand %p2017_p2, %p2011_p9 }
 0x36a   : > { %2021 = shalt.err (!%p2018_p4)
}
 0x36b   : > { %s2022_s24 = scalar_lea.hbm %s1269_s12, 128  ;;  %s2026_s23 = scalar_lea.hbm %s2515_s4, 256 }
 0x36c   : > { %p2023_p5 = scmp.ne.s32.totalorder %s1269_s12, %s2022_s24  ;;  %p2027_p12 = scmp.lt.s32.totalorder %s1269_s12, %s2515_s4 }
 0x36d   : > { %p2028_p11 = scmp.lt.s32.totalorder %s2026_s23, %s2022_s24 }
 0x36e   : > { %p2024_p6 = pnand %p2023_p5, %p2196_p3 }
 0x36f   : > { %p2029_p0 = por %p2028_p11, %p2027_p12 }
 0x370   : > { %p2025_p7 = pneg %p2024_p6 }
 0x372   : > { %p2030_p1 = pnand %p2029_p0, %p2025_p7 }
 0x374   : > { %2033 = shalt.err (!%p2030_p1)
}
 0x375   : > { %1747 = dma.vmem_to_hbm [thread:$0]  (%p2196_p3), %s1272_s8, 128, %s1269_s12, %s1258_s7  }
 0x376 PF: > { %p1769_p9 = scmp.ge.s32.totalorder %s2108_s22, 2  ;;  %s1283_s27 = sand.u32 1, %s2080_s15  }
 0x377   : > { %s1284_s28 = scalar_lea.sflag [#allocation5], %s1283_s27 }
 0x378   : > { %p1760_p10 = pnand %p1769_p9, %p2207_p8 }
 0x37a   : > { %p1761_p13 = pneg %p1760_p10 }
 0x37c   : > { %2075 = dma.done.wait (%p1761_p13), %s1284_s28, 128  }
 0x37d   : > { %2077 = vsyncadd (%p1761_p13), %s1284_s28, 4294967168  ;;  %s19_s22 = sadd.s32 1, %s2108_s22   ;;  %s2523_s15 = smov %s2084_s16 }
 0x37e   : > { %p16_p2 = scmp.ge.s32.totalorder %s19_s22, 6   ;;  %s2524_s16 = smov %s2088_s17 }
 0x37f   : > { %s2525_s17 = smov %s2205_s30  ;;  %s2526_s18 = smov %s2100_s20 }
 0x380   : > { %s2527_s19 = smov %s2104_s21  ;;  %s2528_s20 = smov %s2531_s25 }
 0x381   : > { %s2529_s21 = smov %s2535_s26  ;;  %18 = sbr.rel (!%p16_p2) target bundleno = 7 (0x7), region = 92 }
 0x386   :  { %1289 = vsyncpa [#allocation4], 1 }
 0x387   :  { %1291 = vsyncpa [#allocation4 + $0x1], 1 }
 0x388   :  { %1292 = vsyncpa [#allocation7], 1 }
 0x389   :  { %1293 = vsyncpa [#allocation5], 1 }
 0x38a   :  { %1295 = vsyncpa [#allocation5 + $0x1], 1 }

</bundles_post_ra>
